<compile_context>
chip_gen: v7x
topology: tpu7x:2x2x1
jax: 0.10.0
libtpu: 0.0.40
codegen_flags: <defaults>
</compile_context>

<pallas_src>
import jax
import jax.numpy as jnp
from jax.experimental import pallas as pl
from jax.experimental.pallas import tpu as pltpu


def _round_up(x, m):
    return ((x + m - 1) // m) * m


def _rbm_kernel(t_ref, v_ref, w_ref, wt_ref, a_ref, b_ref, out_ref, v_sc):
    """One Gibbs step per (batch_tile, step) grid point.

    t_ref  : (1, TB, n_hid) bf16   logit(u) thresholds for this step
    v_ref  : (TB, n_vis)    bf16   initial visible tile (consumed at step 0)
    w_ref  : (n_hid, n_vis) bf16   decode orientation
    wt_ref : (n_vis, n_hid) bf16   encode orientation (transpose hoisted)
    a_ref  : (1, n_vis) f32,  b_ref : (1, n_hid) f32
    out_ref: (TB, n_vis) out dtype
    v_sc   : (TB, n_vis) f32 scratch carrying v across Gibbs steps
    """
    step = pl.program_id(1)

    @pl.when(step == 0)
    def _():
        v_sc[...] = v_ref[...].astype(jnp.float32)

    v = v_sc[...]

    # encode + Bernoulli sample, sigmoid-free:
    #   (u < sigmoid(x))  <=>  (x > logit(u))
    logits_h = jnp.dot(v.astype(wt_ref.dtype), wt_ref[...],
                       preferred_element_type=jnp.float32)
    logits_h = logits_h + b_ref[...].astype(jnp.float32)        # (1,H) bcast
    thresh = t_ref[0].astype(jnp.float32)                       # (TB, n_hid)
    h = (logits_h > thresh).astype(w_ref.dtype)                 # exact 0/1 bf16

    # decode: v = sigmoid(h @ W + a), via a single tanh on the EUP.
    logits_v = jnp.dot(h, w_ref[...], preferred_element_type=jnp.float32)
    logits_v = logits_v + a_ref[...].astype(jnp.float32)
    v_new = 0.5 * (1.0 + jnp.tanh(0.5 * logits_v))

    v_sc[...] = v_new

    @pl.when(step == pl.num_programs(1) - 1)
    def _():
        out_ref[...] = v_new.astype(out_ref.dtype)


def rbm_forward(v, W, a, b, key, *, k=1, tile_b=None):
    """Pallas TPU implementation of RBM.forward (k steps of CD Gibbs sampling)."""
    batch, n_vis = v.shape
    n_hid = W.shape[0]
    assert W.shape == (n_hid, n_vis)
    assert a.shape == (1, n_vis)
    assert b.shape == (1, n_hid)
    out_dtype = v.dtype

    # Batch tiling: rows per tile multiple of 8 (sublane).  Guarantee >= 2
    # tiles when batch >= 16 so the "parallel" axis can use both TCs (v7x);
    # allow up to 512 rows/tile to amortize per-grid-step overhead.
    rb = _round_up(batch, 8)
    if tile_b is None:
        if rb >= 16:
            tile_b = min(512, _round_up((rb + 1) // 2, 8))
        else:
            tile_b = rb
    padded = _round_up(batch, tile_b)

    # Bernoulli thresholds t = logit(u), drawn directly at the PADDED shape
    # (no pad copy of the biggest array), shipped as bf16 (halves the DMA;
    # ~2^-8 threshold rounding is irrelevant for sampling).  u == 0 gives
    # t = -inf, which reproduces "u < p always true" exactly.
    u = jax.random.uniform(key, (k, padded, n_hid), dtype=jnp.float32)
    t = (jnp.log(u) - jnp.log1p(-u)).astype(jnp.bfloat16)

    # bf16 MXU operands; W.T computed once here (never inside the kernel).
    W_bf = W.astype(jnp.bfloat16)
    Wt_bf = W.T.astype(jnp.bfloat16)
    a_f = a.astype(jnp.float32)
    b_f = b.astype(jnp.float32)

    # v in bf16 (it is cast to bf16 for the MXU anyway) -> half the v DMA.
    v_bf = v.astype(jnp.bfloat16)
    if padded != batch:
        # Padded rows are zeros; their samples/outputs are sliced off below.
        v_bf = jnp.zeros((padded, n_vis), jnp.bfloat16).at[:batch].set(v_bf)

    n_tiles = padded // tile_b
    grid = (n_tiles, k)

    # Explicit VMEM budget: double-buffered inputs + resident weights (both
    # orientations) + output block + scratch, with generous headroom.
    blk = (2 * tile_b * n_hid * 2          # thresholds (bf16, 2 buffers)
           + 2 * tile_b * n_vis * 2        # v tile (bf16)
           + 2 * 2 * n_hid * n_vis * 2     # W and W.T (bf16, 2 buffers each)
           + 2 * (n_vis + n_hid) * 4       # biases
           + 2 * tile_b * n_vis * 4        # out tile (f32)
           + tile_b * n_vis * 4)           # v scratch (f32)
    vmem_limit = int(min(128 * 1024 * 1024,
                         max(32 * 1024 * 1024, blk * 3 // 2 + (4 << 20))))

    out = pl.pallas_call(
        _rbm_kernel,
        out_shape=jax.ShapeDtypeStruct((padded, n_vis), out_dtype),
        grid_spec=pltpu.PrefetchScalarGridSpec(
            num_scalar_prefetch=0,
            grid=grid,
            in_specs=[
                pl.BlockSpec((1, tile_b, n_hid), lambda i, s: (s, i, 0)),  # thresholds
                pl.BlockSpec((tile_b, n_vis), lambda i, s: (i, 0)),        # v0 tile
                pl.BlockSpec((n_hid, n_vis), lambda i, s: (0, 0)),         # W   (resident)
                pl.BlockSpec((n_vis, n_hid), lambda i, s: (0, 0)),         # W.T (resident)
                pl.BlockSpec((1, n_vis), lambda i, s: (0, 0)),             # a
                pl.BlockSpec((1, n_hid), lambda i, s: (0, 0)),             # b
            ],
            out_specs=pl.BlockSpec((tile_b, n_vis), lambda i, s: (i, 0)),
            scratch_shapes=[pltpu.VMEM((tile_b, n_vis), jnp.float32)],
        ),
        compiler_params=pltpu.CompilerParams(
            dimension_semantics=("parallel", "arbitrary"),  # tiles || , steps seq
            vmem_limit_bytes=vmem_limit,
        ),
    )(t, v_bf, W_bf, Wt_bf, a_f, b_f)

    return out[:batch]


if __name__ == "__main__":
    # Small, tile-friendly shapes consistent with the module:
    #   conf.n_vis = 256, conf.n_hid = 128, batch = 8, k = 1
    batch, n_vis, n_hid, k = 8, 256, 128, 1

    key = jax.random.PRNGKey(0)
    k0, k1, k2, k3, k_bern, k4, k_bern2 = jax.random.split(key, 7)

    # Deterministic "randn" parameter init (same shapes as the nn.Parameters).
    a = jax.random.normal(k0, (1, n_vis), dtype=jnp.float32)
    b = jax.random.normal(k1, (1, n_hid), dtype=jnp.float32)
    W = jax.random.normal(k2, (n_hid, n_vis), dtype=jnp.float32)

    # Example visible input in [0, 1] (typical RBM input domain).
    v = jax.random.uniform(k3, (batch, n_vis), dtype=jnp.float32)

    out = rbm_forward(v, W, a, b, k_bern, k=k)
    out = jax.block_until_ready(out)

    assert out.shape == (batch, n_vis)
    assert out.dtype == jnp.float32
    assert bool(jnp.all(jnp.isfinite(out)))
    assert bool(jnp.all((out >= 0.0) & (out <= 1.0)))  # sigmoid output

    # Exercise the multi-tile + multi-step (grid axis 1) + padding path too.
    batch2, k2_steps = 24, 2
    v2 = jax.random.uniform(k4, (batch2, n_vis), dtype=jnp.float32)
    out2 = jax.block_until_ready(rbm_forward(v2, W, a, b, k_bern2, k=k2_steps))
    assert out2.shape == (batch2, n_vis)
    assert bool(jnp.all(jnp.isfinite(out2)))
    assert bool(jnp.all((out2 >= 0.0) & (out2 <= 1.0)))

    print("KERNEL_OK")
</pallas_src>

<mosaic_0001>
module attributes {stable_mosaic.version = 11 : i64} {
  func.func @_rbm_kernel(%arg0: i32, %arg1: i32, %arg2: memref<1x8x128xbf16, #tpu.memory_space<vmem>>, %arg3: memref<8x256xbf16, #tpu.memory_space<vmem>>, %arg4: memref<128x256xbf16, #tpu.memory_space<vmem>>, %arg5: memref<256x128xbf16, #tpu.memory_space<vmem>>, %arg6: memref<1x256xf32, #tpu.memory_space<vmem>>, %arg7: memref<1x128xf32, #tpu.memory_space<vmem>>, %arg8: memref<8x256xf32, #tpu.memory_space<vmem>>, %arg9: memref<8x256xf32, #tpu.memory_space<vmem>>) attributes {dimension_semantics = [#tpu.dimension_semantics<parallel>, #tpu.dimension_semantics<arbitrary>], iteration_bounds = array<i64: 1, 1>, scalar_prefetch = 0 : i64, scratch_operands = 1 : i64, tpu.core_type = #tpu.core_type<tc>, window_params = [{transform_indices = @transform_0, window_bounds = array<i64: 1, 8, 128>}, {transform_indices = @transform_1, window_bounds = array<i64: 8, 256>}, {pipeline_mode = #tpu.pipeline_mode<synchronous>, transform_indices = @transform_2, window_bounds = array<i64: 128, 256>}, {pipeline_mode = #tpu.pipeline_mode<synchronous>, transform_indices = @transform_3, window_bounds = array<i64: 256, 128>}, {pipeline_mode = #tpu.pipeline_mode<synchronous>, transform_indices = @transform_4, window_bounds = array<i64: 1, 256>}, {pipeline_mode = #tpu.pipeline_mode<synchronous>, transform_indices = @transform_5, window_bounds = array<i64: 1, 128>}, {transform_indices = @transform_6, window_bounds = array<i64: 8, 256>}]} {
    %c0_i32 = arith.constant 0 : i32
    %0 = arith.cmpi eq, %arg1, %c0_i32 : i32
    %1 = arith.extui %0 : i1 to i32
    %c0_i32_0 = arith.constant 0 : i32
    %2 = arith.cmpi ne, %1, %c0_i32_0 : i32
    scf.if %2 {
      %c0_21 = arith.constant 0 : index
      %c0_22 = arith.constant 0 : index
      %33 = vector.load %arg3[%c0_21, %c0_22] : memref<8x256xbf16, #tpu.memory_space<vmem>>, vector<8x256xbf16>
      %34 = arith.extf %33 : vector<8x256xbf16> to vector<8x256xf32>
      %c0_23 = arith.constant 0 : index
      %c0_24 = arith.constant 0 : index
      %35 = vector.load %arg9[%c0_23, %c0_24] : memref<8x256xf32, #tpu.memory_space<vmem>>, vector<8x256xf32>
      tpu.vector_store %arg9[%c0_23, %c0_24], %34 {strides = array<i32>} : memref<8x256xf32, #tpu.memory_space<vmem>>, vector<8x256xf32>,
    } else {
    }
    %c0 = arith.constant 0 : index
    %c0_1 = arith.constant 0 : index
    %3 = vector.load %arg9[%c0, %c0_1] : memref<8x256xf32, #tpu.memory_space<vmem>>, vector<8x256xf32>
    %4 = arith.truncf %3 : vector<8x256xf32> to vector<8x256xbf16>
    %c0_2 = arith.constant 0 : index
    %c0_3 = arith.constant 0 : index
    %5 = vector.load %arg5[%c0_2, %c0_3] : memref<256x128xbf16, #tpu.memory_space<vmem>>, vector<256x128xbf16>
    %cst = arith.constant dense<0.000000e+00> : vector<8x128xf32>
    %6 = tpu.matmul %4, %5, %cst {dimension_numbers = #tpu.dot_dimension_numbers<[1], [0], [0], [1], [0, 0, 1, 1], [], []>} : vector<8x256xbf16>, vector<256x128xbf16>, vector<8x128xf32> -> vector<8x128xf32>
    %c0_4 = arith.constant 0 : index
    %c0_5 = arith.constant 0 : index
    %7 = vector.load %arg7[%c0_4, %c0_5] : memref<1x128xf32, #tpu.memory_space<vmem>>, vector<1x128xf32>
    %8 = vector.broadcast %7 : vector<1x128xf32> to vector<8x128xf32>
    %9 = arith.addf %6, %8 : vector<8x128xf32>
    %c0_6 = arith.constant 0 : index
    %c0_7 = arith.constant 0 : index
    %c0_8 = arith.constant 0 : index
    %10 = vector.load %arg2[%c0_6, %c0_7, %c0_8] : memref<1x8x128xbf16, #tpu.memory_space<vmem>>, vector<1x8x128xbf16>
    %11 = vector.shape_cast %10 : vector<1x8x128xbf16> to vector<8x128xbf16>
    %12 = arith.extf %11 : vector<8x128xbf16> to vector<8x128xf32>
    %13 = arith.cmpf ogt, %9, %12 : vector<8x128xf32>
    %14 = arith.extui %13 : vector<8x128xi1> to vector<8x128xi32>
    %15 = arith.sitofp %14 : vector<8x128xi32> to vector<8x128xf32>
    %16 = arith.truncf %15 : vector<8x128xf32> to vector<8x128xbf16>
    %c0_9 = arith.constant 0 : index
    %c0_10 = arith.constant 0 : index
    %17 = vector.load %arg4[%c0_9, %c0_10] : memref<128x256xbf16, #tpu.memory_space<vmem>>, vector<128x256xbf16>
    %cst_11 = arith.constant dense<0.000000e+00> : vector<8x256xf32>
    %18 = tpu.matmul %16, %17, %cst_11 {dimension_numbers = #tpu.dot_dimension_numbers<[1], [0], [0], [1], [0, 0, 1, 1], [], []>} : vector<8x128xbf16>, vector<128x256xbf16>, vector<8x256xf32> -> vector<8x256xf32>
    %c0_12 = arith.constant 0 : index
    %c0_13 = arith.constant 0 : index
    %19 = vector.load %arg6[%c0_12, %c0_13] : memref<1x256xf32, #tpu.memory_space<vmem>>, vector<1x256xf32>
    %20 = vector.broadcast %19 : vector<1x256xf32> to vector<8x256xf32>
    %21 = arith.addf %18, %20 : vector<8x256xf32>
    %cst_14 = arith.constant 5.000000e-01 : f32
    %22 = vector.broadcast %cst_14 : f32 to vector<8x256xf32>
    %23 = arith.mulf %22, %21 : vector<8x256xf32>
    %24 = math.tanh %23 : vector<8x256xf32>
    %cst_15 = arith.constant 1.000000e+00 : f32
    %25 = vector.broadcast %cst_15 : f32 to vector<8x256xf32>
    %26 = arith.addf %25, %24 : vector<8x256xf32>
    %cst_16 = arith.constant 5.000000e-01 : f32
    %27 = vector.broadcast %cst_16 : f32 to vector<8x256xf32>
    %28 = arith.mulf %27, %26 : vector<8x256xf32>
    %c0_17 = arith.constant 0 : index
    %c0_18 = arith.constant 0 : index
    %29 = vector.load %arg9[%c0_17, %c0_18] : memref<8x256xf32, #tpu.memory_space<vmem>>, vector<8x256xf32>
    tpu.vector_store %arg9[%c0_17, %c0_18], %28 {strides = array<i32>} : memref<8x256xf32, #tpu.memory_space<vmem>>, vector<8x256xf32>,
    %c0_i32_19 = arith.constant 0 : i32
    %30 = arith.cmpi eq, %arg1, %c0_i32_19 : i32
    %31 = arith.extui %30 : i1 to i32
    %c0_i32_20 = arith.constant 0 : i32
    %32 = arith.cmpi ne, %31, %c0_i32_20 : i32
    scf.if %32 {
      %c0_21 = arith.constant 0 : index
      %c0_22 = arith.constant 0 : index
      %33 = vector.load %arg8[%c0_21, %c0_22] : memref<8x256xf32, #tpu.memory_space<vmem>>, vector<8x256xf32>
      tpu.vector_store %arg8[%c0_21, %c0_22], %28 {strides = array<i32>} : memref<8x256xf32, #tpu.memory_space<vmem>>, vector<8x256xf32>,
    } else {
    }
    return
  }
  func.func @transform_0(%arg0: i32, %arg1: i32) -> (i32, i32, i32) {
    %c0_i32 = arith.constant 0 : i32
    %c0_i32_0 = arith.constant 0 : i32
    return %arg1, %arg0, %c0_i32 : i32, i32, i32
  }
  func.func @transform_1(%arg0: i32, %arg1: i32) -> (i32, i32) {
    %c0_i32 = arith.constant 0 : i32
    %c0_i32_0 = arith.constant 0 : i32
    return %arg0, %c0_i32 : i32, i32
  }
  func.func @transform_2(%arg0: i32, %arg1: i32) -> (i32, i32) {
    %c0_i32 = arith.constant 0 : i32
    %c0_i32_0 = arith.constant 0 : i32
    %c0_i32_1 = arith.constant 0 : i32
    return %c0_i32, %c0_i32_0 : i32, i32
  }
  func.func @transform_3(%arg0: i32, %arg1: i32) -> (i32, i32) {
    %c0_i32 = arith.constant 0 : i32
    %c0_i32_0 = arith.constant 0 : i32
    %c0_i32_1 = arith.constant 0 : i32
    return %c0_i32, %c0_i32_0 : i32, i32
  }
  func.func @transform_4(%arg0: i32, %arg1: i32) -> (i32, i32) {
    %c0_i32 = arith.constant 0 : i32
    %c0_i32_0 = arith.constant 0 : i32
    %c0_i32_1 = arith.constant 0 : i32
    return %c0_i32, %c0_i32_0 : i32, i32
  }
  func.func @transform_5(%arg0: i32, %arg1: i32) -> (i32, i32) {
    %c0_i32 = arith.constant 0 : i32
    %c0_i32_0 = arith.constant 0 : i32
    %c0_i32_1 = arith.constant 0 : i32
    return %c0_i32, %c0_i32_0 : i32, i32
  }
  func.func @transform_6(%arg0: i32, %arg1: i32) -> (i32, i32) {
    %c0_i32 = arith.constant 0 : i32
    %c0_i32_0 = arith.constant 0 : i32
    return %arg0, %c0_i32 : i32, i32
  }
}

</mosaic_0001>

<bundles_post_ra>
// kernel: tpu_custom_call.1
= control target key start
LH: loop header
LB: loop body
LE: loop exit
PB: predicated region body
PF: predicated region fallthrough
CT: control target
= control target key end

     0   :  { %11 = vsyncpa [#allocation4], 0  ;;  %s798_s0 = inlined_call_operand.hbm [shape: bf16[1,8,128], index: 0, kind: input, shape index: {}]   ;;  %s799_s1 = inlined_call_operand.hbm [shape: bf16[8,256], index: 1, kind: input, shape index: {}]   ;;  %s800_s2 = inlined_call_operand.hbm [shape: bf16[128,256], index: 2, kind: input, shape index: {}]   ;;  %s801_s3 = inlined_call_operand.hbm [shape: bf16[256,128], index: 3, kind: input, shape index: {}]   ;;  %s802_s4 = inlined_call_operand.vmem [shape: f32[1,256], index: 4, kind: input, shape index: {}]   ;;  %s803_s5 = inlined_call_operand.vmem [shape: f32[1,128], index: 5, kind: input, shape index: {}]   ;;  %s804_s6 = inlined_call_operand.hbm [shape: f32[8,256], index: 6, kind: output, shape index: {}]  }
   0x1   :  { %12 = vsyncpa [#allocation7], 0 }
   0x2   :  { %13 = vsyncpa [#allocation10], 0 }
   0x3   :  { %14 = vsyncpa [#allocation5], 0  ;;  %s686_s21 = smov [#allocation6]   ;;  %s687_s23 = smov [#allocation3]  }
   0x4   :  { %s31_s22 = sshll.u32 %s686_s21, 4  ;;  %s21_s24 = sshll.u32 %s687_s23, 4  ;;  %s32_s22 = int_to_ptr.vmem [resolvable:$true] %s31_s22  ;;  %s22_s24 = int_to_ptr.vmem [resolvable:$true] %s21_s24 }
   0x5   :  { %s568_s27 = scalar_lea.hbm %s799_s1, 128 }
   0x6   :  { %p569_p0 = scmp.ne.s32.totalorder %s799_s1, %s568_s27  ;;  %p572_p1 = scmp.lt.u32.totalorder %s568_s27, %s799_s1 }
   0x8   :  { %p574_p2 = pnand %p572_p1, %p569_p0 }
   0xa   :  { %577 = shalt.err (!%p574_p2)
}
   0xb   :  { %s578_s8 = scalar_lea.vmem %s32_s22, 128  ;;  %p583_p4 = scmp.lt.s32.totalorder %s32_s22, %s32_s22 }
   0xc   :  { %p579_p3 = scmp.ne.s32.totalorder %s32_s22, %s578_s8  ;;  %p584_p5 = scmp.lt.s32.totalorder %s578_s8, %s578_s8 }
   0xe   :  { %p585_p6 = por %p584_p5, %p583_p4 }
  0x10   :  { %p586_p7 = pnand %p585_p6, %p579_p3 }
  0x12   :  { %589 = shalt.err (!%p586_p7)
}
  0x13   :  { %34 = dma.hbm_to_vmem [thread:$0]  %s799_s1, 128, %s32_s22, [#allocation7]  }
  0x14   :  { %s590_s13 = scalar_lea.hbm %s798_s0, 64 }
  0x15   :  { %p591_p8 = scmp.ne.s32.totalorder %s798_s0, %s590_s13  ;;  %p594_p9 = scmp.lt.u32.totalorder %s590_s13, %s798_s0 }
  0x17   :  { %p596_p10 = pnand %p594_p9, %p591_p8 }
  0x19   :  { %599 = shalt.err (!%p596_p10)
}
  0x1a   :  { %s600_s18 = scalar_lea.vmem %s22_s24, 64  ;;  %p605_p12 = scmp.lt.s32.totalorder %s22_s24, %s22_s24 }
  0x1b   :  { %p601_p11 = scmp.ne.s32.totalorder %s22_s24, %s600_s18  ;;  %p606_p13 = scmp.lt.s32.totalorder %s600_s18, %s600_s18 }
  0x1d   :  { %p607_p0 = por %p606_p13, %p605_p12 }
  0x1f   :  { %p608_p1 = pnand %p607_p0, %p601_p11 }
  0x21   :  { %611 = shalt.err (!%p608_p1)
}
  0x22   :  { %24 = dma.hbm_to_vmem [thread:$0]  %s798_s0, 64, %s22_s24, [#allocation4]  }
  0x23   :  { %s688_s20 = smov [#allocation8]   ;;  %s612_s25 = scalar_lea.hbm %s800_s2, 2048 }
  0x24   :  { %s40_s21 = sshll.u32 %s688_s20, 4  ;;  %p613_p2 = scmp.ne.s32.totalorder %s800_s2, %s612_s25  ;;  %s41_s21 = int_to_ptr.vmem [resolvable:$true] %s40_s21 }
  0x25   :  { %p616_p3 = scmp.lt.u32.totalorder %s612_s25, %s800_s2 }
  0x27   :  { %p618_p4 = pnand %p616_p3, %p613_p2 }
  0x29   :  { %621 = shalt.err (!%p618_p4)
}
  0x2a   :  { %s622_s30 = scalar_lea.vmem %s41_s21, 2048  ;;  %p627_p6 = scmp.lt.s32.totalorder %s41_s21, %s41_s21 }
  0x2b   :  { %p623_p5 = scmp.ne.s32.totalorder %s41_s21, %s622_s30  ;;  %p628_p7 = scmp.lt.s32.totalorder %s622_s30, %s622_s30 }
  0x2d   :  { %p629_p8 = por %p628_p7, %p627_p6 }
  0x2f   :  { %p630_p9 = pnand %p629_p8, %p623_p5 }
  0x31   :  { %633 = shalt.err (!%p630_p9)
}
  0x32   :  { %s689_s0 = smov 128   ;;  %s690_s24 = smov 8  }
  0x33   :  { %46 = dma.hbm_to_vmem [thread:$0]  %s800_s2, 2048, %s41_s21, [#allocation7], %s689_s0, %s689_s0, %s690_s24  }
  0x34   :  { %s691_s9 = smov [#allocation9]   ;;  %s634_s13 = scalar_lea.hbm %s801_s3, 2048 }
  0x35   :  { %s52_s10 = sshll.u32 %s691_s9, 4  ;;  %p635_p10 = scmp.ne.s32.totalorder %s801_s3, %s634_s13  ;;  %s53_s10 = int_to_ptr.vmem [resolvable:$true] %s52_s10 }
  0x36   :  { %p638_p11 = scmp.lt.u32.totalorder %s634_s13, %s801_s3 }
  0x38   :  { %p640_p12 = pnand %p638_p11, %p635_p10 }
  0x3a   :  { %643 = shalt.err (!%p640_p12)
}
  0x3b   :  { %s644_s18 = scalar_lea.vmem %s53_s10, 2048  ;;  %p649_p0 = scmp.lt.s32.totalorder %s53_s10, %s53_s10 }
  0x3c   :  { %p645_p13 = scmp.ne.s32.totalorder %s53_s10, %s644_s18  ;;  %p650_p1 = scmp.lt.s32.totalorder %s644_s18, %s644_s18 }
  0x3e   :  { %p651_p2 = por %p650_p1, %p649_p0 }
  0x40   :  { %p652_p3 = pnand %p651_p2, %p645_p13 }
  0x42   :  { %655 = shalt.err (!%p652_p3)
}
  0x43   :  { %s692_s2 = smov 64   ;;  %s693_s1 = smov 4  }
  0x44   :  { %58 = dma.hbm_to_vmem [thread:$0]  %s801_s3, 2048, %s53_s10, [#allocation10], %s692_s2, %s692_s2, %s693_s1  }
  0x45   :  { %678 = dma.done.wait [#allocation4], 64  }
  0x46   :  { %679 = vsyncadd [#allocation4], 4294967232 }
  0x47   :  { %680 = dma.done.wait [#allocation7], 2176  }
  0x48   :  { %681 = vsyncadd [#allocation7], 4294965120 }
  0x49   :  { %682 = dma.done.wait [#allocation10], 2048  }
  0x4a   :  { %683 = vsyncadd [#allocation10], 4294965248  ;;  %v522_v0 = vld [vmem:[#allocation9 + $0x40] sm:$0xff]   ;;  %v524_v2 = vld [vmem:[#allocation9 + $0x48] sm:$0xff]   ;;  %v694_v35 = vmov 0   ;;  %v288_v46 = vlaneseq }
  0x4b   :  { %v523_v1 = vld [vmem:[#allocation9] sm:$0xff]   ;;  %489 = vmatprep.subr.bf16.mxu0 %v522_v0  ;;  %v525_v3 = vld [vmem:[#allocation9 + $0x8] sm:$0xff]   ;;  %v526_v4 = vld [vmem:[#allocation9 + $0x50] sm:$0xff]   ;;  %410 = vmatprep.mubr.bf16.mxu1 %v694_v35  ;;  %v695_v45 = vmov 1.0|1.0  }
  0x4c   :  { %490 = vmatpush3.bf16.msra.mxu0 %v523_v1  ;;  %v527_v5 = vld [vmem:[#allocation9 + $0x10] sm:$0xff]   ;;  %v528_v6 = vld [vmem:[#allocation9 + $0x58] sm:$0xff]   ;;  %v530_v8 = vld [vmem:[#allocation9 + $0x60] sm:$0xff]   ;;  %v289_v47 = vshrl.u32 %v288_v46, 7 }
  0x4d   :  { %491 = vmatprep.subr.bf16.mxu0 %v524_v2  ;;  %v529_v7 = vld [vmem:[#allocation9 + $0x18] sm:$0xff]   ;;  %v531_v9 = vld [vmem:[#allocation9 + $0x20] sm:$0xff]   ;;  %v532_v10 = vld [vmem:[#allocation9 + $0x68] sm:$0xff]  }
  0x4e   :  { %v80_v11 = vld [vmem:[#allocation6] sm:$0xff]  ;;  %v540_v13 = vld [vmem:[#allocation8 + $0x4] ss:$8 sps:$4 sm:$0xff]   ;;  %v542_v14 = vld [vmem:[#allocation8] ss:$8 sps:$4 sm:$0xff]   ;;  %v290_v48 = vsub.s32 0, %v289_v47 }
  0x4f   :  { %v488_v12 = vcombine.high %v80_v11, %v80_v11  ;;  %v543_v15 = vld [vmem:[#allocation8 + $0x14] ss:$8 sps:$4 sm:$0xff]   ;;  %v533_v16 = vld [vmem:[#allocation9 + $0x28] sm:$0xff]   ;;  %378 = vmatprep.subr.bf16.mxu1 %v540_v13  ;;  %v545_v18 = vld [vmem:[#allocation8 + $0x10] ss:$8 sps:$4 sm:$0xff]   ;;  %v487_v26 = vcombine.low %v80_v11, %v80_v11  ;;  %v294_v50 = vsub.s32 1, %v289_v47 }
  0x50   :  { %492 = vmatpush3.bf16.msra.mxu0 %v525_v3  ;;  %v534_v17 = vld [vmem:[#allocation9 + $0x70] sm:$0xff]   ;;  %379 = vmatpush1.bf16.msra.mxu1 %v542_v14  ;;  %v546_v19 = vld [vmem:[#allocation8 + $0x24] ss:$8 sps:$4 sm:$0xff]   ;;  %v536_v21 = vld [vmem:[#allocation9 + $0x78] sm:$0xff]  }
  0x51   :  { %493 = vmatprep.subr.bf16.mxu0 %v526_v4  ;;  %256 = vmatprep.mubr.bf16.mxu0 %v488_v12  ;;  %v535_v20 = vld [vmem:[#allocation9 + $0x30] sm:$0xff]   ;;  %v548_v22 = vld [vmem:[#allocation8 + $0x20] ss:$8 sps:$4 sm:$0xff]   ;;  %v537_v24 = vld [vmem:[#allocation9 + $0x38] sm:$0xff]  }
  0x52   :  { %380 = vmatprep.subr.bf16.mxu1 %v543_v15  ;;  %v549_v23 = vld [vmem:[#allocation8 + $0x34] ss:$8 sps:$4 sm:$0xff]   ;;  %v551_v25 = vld [vmem:[#allocation8 + $0x30] ss:$8 sps:$4 sm:$0xff]   ;;  %v552_v27 = vld [vmem:[#allocation8 + $0x44] ss:$8 sps:$4 sm:$0xff]  }
  0x53   :  { %v554_v28 = vld [vmem:[#allocation8 + $0x40] ss:$8 sps:$4 sm:$0xff]   ;;  %v555_v29 = vld [vmem:[#allocation8 + $0x54] ss:$8 sps:$4 sm:$0xff]   ;;  %v557_v30 = vld [vmem:[#allocation8 + $0x50] ss:$8 sps:$4 sm:$0xff]  }
  0x54   :  { %494 = vmatpush3.bf16.msra.mxu0 %v527_v5  ;;  %381 = vmatpush1.bf16.msra.mxu1 %v545_v18  ;;  %v558_v31 = vld [vmem:[#allocation8 + $0x64] ss:$8 sps:$4 sm:$0xff]   ;;  %v560_v32 = vld [vmem:[#allocation8 + $0x60] ss:$8 sps:$4 sm:$0xff]   ;;  %v561_v33 = vld [vmem:[#allocation8 + $0x74] ss:$8 sps:$4 sm:$0xff]  }
  0x55   :  { %495 = vmatprep.subr.bf16.mxu0 %v528_v6  ;;  %382 = vmatprep.subr.bf16.mxu1 %v546_v19  ;;  %v563_v34 = vld [vmem:[#allocation8 + $0x70] ss:$8 sps:$4 sm:$0xff]   ;;  %v264_v36 = vld [vmem:[#allocation3] sm:$0xf] }
  0x56   :  { %v451_v38 = vld [vmem:[%s803_s5] ss:$0 sm:$0xff]  ;;  %v265_v42 = vunpack.c.l.bf16 %v264_v36  ;;  %s696_s5 = smov [#allocation11]  }
  0x57   :  { %v286_v49 = vld [vmem:[%s802_s4] sm:$0x3]  ;;  %s440_s25 = sshll.u32 %s696_s5, 4  ;;  %s441_s25 = int_to_ptr.vmem [resolvable:$true] %s440_s25 }
  0x58   :  { %496 = vmatpush3.bf16.msra.mxu0 %v529_v7  ;;  %383 = vmatpush1.bf16.msra.mxu1 %v548_v22  ;;  %v291_v51 = vrot.slane %v286_v49, %v290_v48  ;;  %v295_v52 = vrot.slane %v286_v49, %v294_v50  ;;  %s656_s4 = scalar_lea.vmem %s441_s25, 256  ;;  %p661_p5 = scmp.lt.s32.totalorder %s441_s25, %s441_s25 }
  0x59   :  { %497 = vmatprep.subr.bf16.mxu0 %v530_v8  ;;  %384 = vmatprep.subr.bf16.mxu1 %v549_v23  ;;  %p657_p4 = scmp.ne.s32.totalorder %s441_s25, %s656_s4  ;;  %p662_p6 = scmp.lt.s32.totalorder %s656_s4, %s656_s4 }
  0x5b   :  { %p663_p7 = por %p662_p6, %p661_p5 }
  0x5c   :  { %498 = vmatpush3.bf16.msra.mxu0 %v531_v9  ;;  %385 = vmatpush1.bf16.msra.mxu1 %v551_v25 }
  0x5d   :  { %499 = vmatprep.subr.bf16.mxu0 %v532_v10  ;;  %386 = vmatprep.subr.bf16.mxu1 %v552_v27  ;;  %p664_p8 = pnand %p663_p7, %p657_p4 }
  0x60   :  { %500 = vmatpush3.bf16.msra.mxu0 %v533_v16  ;;  %387 = vmatpush1.bf16.msra.mxu1 %v554_v28 }
  0x61   :  { %501 = vmatprep.subr.bf16.mxu0 %v534_v17  ;;  %388 = vmatprep.subr.bf16.mxu1 %v555_v29 }
  0x64   :  { %502 = vmatpush3.bf16.msra.mxu0 %v535_v20  ;;  %389 = vmatpush1.bf16.msra.mxu1 %v557_v30 }
  0x65   :  { %503 = vmatprep.subr.bf16.mxu0 %v536_v21  ;;  %390 = vmatprep.subr.bf16.mxu1 %v558_v31 }
  0x68   :  { %504 = vmatpush3.bf16.msra.mxu0 %v537_v24  ;;  %391 = vmatpush1.bf16.msra.mxu1 %v560_v32 }
  0x69   :  { %392 = vmatprep.subr.bf16.mxu1 %v561_v33 }
  0x6b   :  { %257 = vmatmul.mubr.bf16.vlgmr.msra.gmra.mrb[0].mxu0 %v487_v26 }
  0x6c   :  { %393 = vmatpush1.bf16.msra.mxu1 %v563_v34 }
 0x13e   :  { %v505_v37 = vpop.f32.mrb[0].mxu0 }
 0x13f   :  { %v506_v39 = vpop.f32.mrb[1].mxu0 }
 0x140   :  { %v507_v40 = vadd.f32 %v506_v39, %v505_v37  ;;  %v508_v41 = vpop.f32.mrb[2].mxu0 }
 0x141   :  { %v509_v43 = vpop.f32.mrb[3].mxu0 }
 0x142   :  { %v259_v44 = vadd.f32 %v507_v40, %v451_v38 }
 0x144   :  { %vm266_vm0 = vcmp.gt.f32.partialorder %v259_v44, %v265_v42 }
 0x145   :  { %vm485_vm1 = vmpackc.low %vm266_vm0, %vm266_vm0 }
 0x146   :  { %486 = vmatmul.mubr.msk.bf16.vlgmr.msra.gmra.mrb[0].mxu1 %vm485_vm1, %v695_v45 }
 0x219   :  { %v412_v53 = vpop.f32.mrb[0].mxu1 }
 0x21a   :  { %v413_v54 = vadd.f32 %v412_v53, %v291_v51  ;;  %v414_v55 = vpop.f32.mrb[1].mxu1 }
 0x21b   :  { %v415_v56 = vadd.f32 %v414_v55, %v295_v52  ;;  %v416_v57 = vpop.f32.mrb[2].mxu1 }
 0x21c   :  { %v419_v58 = vmul.f32 0.5, %v413_v54  ;;  %v417_v59 = vpop.f32.mrb[3].mxu1 }
 0x21d   :  { %v420_v60 = vmul.f32 0.5, %v415_v56 }
 0x21e   :  { %564 = vtanh.f32 %v419_v58 }
 0x21f   :  { %566 = vtanh.f32 %v420_v60 }
 0x228   :  { %v565_v61 = vpop.eup %564 }
 0x229   :  { %v567_v62 = vpop.eup %566  ;;  %v423_v63 = vadd.f32 1.0, %v565_v61 }
 0x22a   :  { %v424_v0 = vadd.f32 1.0, %v567_v62 }
 0x22b   :  { %v425_v1 = vmul.f32 0.5, %v423_v63 }
 0x22c   :  { %v426_v2 = vmul.f32 0.5, %v424_v0 }
 0x22d   :  { %432 = vst [vmem:[#allocation11] sm:$0xff] %v425_v1 }
 0x22e   :  { %433 = vst [vmem:[#allocation11 + $0x8] sm:$0xff] %v426_v2 }
 0x22f   :  { %667 = shalt.err (!%p664_p8)
}
 0x230   :  { %s668_s28 = scalar_lea.hbm %s804_s6, 256 }
 0x231   :  { %p669_p9 = scmp.ne.s32.totalorder %s804_s6, %s668_s28  ;;  %p672_p10 = scmp.lt.u32.totalorder %s668_s28, %s804_s6 }
 0x233   :  { %p674_p11 = pnand %p672_p10, %p669_p9 }
 0x235   :  { %677 = shalt.err (!%p674_p11)
}
 0x236   :  { %443 = dma.vmem_to_hbm [thread:$0]  %s441_s25, 256, %s804_s6, [#allocation5]  }
 0x237   :  { %684 = dma.done.wait [#allocation5], 256  }
 0x238   :  { %685 = vsyncadd [#allocation5], 4294967040 }
 0x239   :  { %447 = vsyncpa [#allocation4], 1 }
 0x23a   :  { %448 = vsyncpa [#allocation7], 1 }
 0x23b   :  { %449 = vsyncpa [#allocation10], 1 }
 0x23c   :  { %450 = vsyncpa [#allocation5], 1 }

</bundles_post_ra>
